<compile_context>
chip_gen: v6e
topology: v6e:2x2x1
jax: 0.10.0
libtpu: 0.0.40
codegen_flags: <defaults>
</compile_context>

<pallas_src>
import jax
import jax.numpy as jnp
from jax.experimental import pallas as pl
from jax.experimental.pallas import tpu as pltpu


def _autoencoder_kernel(x_ref, wg_ref, bg_ref, wh_ref, bh_ref, o_ref):
    # Encoder: hidden = sigmoid(x @ Wg + bg)         (K padded to multiple of 128)
    x = x_ref[...]                                    # (TB, Q)
    z1 = jnp.dot(x, wg_ref[...],
                 preferred_element_type=jnp.float32)  # (TB, Kp)
    z1 = z1 + bg_ref[...]                             # broadcast (1, Kp)
    h = jax.nn.sigmoid(z1)

    # Decoder: out = sigmoid(h @ Wh + bh); padded hidden lanes hit zero Wh rows.
    z2 = jnp.dot(h, wh_ref[...],
                 preferred_element_type=jnp.float32)  # (TB, Q)
    z2 = z2 + bh_ref[...]                             # broadcast (1, Q)
    o_ref[...] = jax.nn.sigmoid(z2).astype(o_ref.dtype)


def _round_up(x, m):
    return (x + m - 1) // m * m


def autoencoder_forward(x, wg, bg, wh, bh, *, tb=256):
    """x: (B, Q); wg: (Q, K); bg: (1, K) or (K,); wh: (K, Q); bh: (1, Q) or (Q,).

    Weights are stored pre-transposed as (in_features, out_features) so the
    kernel does plain row-major x @ W + b on the MXU. Returns (B, Q).
    """
    B, Q = x.shape
    K = wg.shape[1]
    bg = bg.reshape(1, K)
    bh = bh.reshape(1, Q)

    # --- Pad hidden dim K up to a multiple of 128 (full-lane vregs, clean MXU tiles).
    Kp = _round_up(K, 128)
    if Kp != K:
        wg = jnp.pad(wg, ((0, 0), (0, Kp - K)))   # zero columns
        bg = jnp.pad(bg, ((0, 0), (0, Kp - K)))   # zero bias lanes
        wh = jnp.pad(wh, ((0, Kp - K), (0, 0)))   # zero rows kill padded hidden lanes

    # --- Tile over batch; weights stay VMEM-resident (constant block index).
    Bp = _round_up(B, 8)
    if Bp <= tb:
        TB = Bp                       # single grid step for small batches
    else:
        TB = tb
        Bp = _round_up(B, TB)
    if Bp != B:
        x = jnp.pad(x, ((0, Bp - B), (0, 0)))

    grid = (Bp // TB,)

    cost = pl.CostEstimate(
        flops=2 * 2 * Bp * Q * Kp,                    # two matmuls
        transcendentals=Bp * (Kp + Q),                # two sigmoids (exp)
        bytes_accessed=4 * (Bp * Q * 2 + Q * Kp * 2 + Kp + Q),
    )

    out = pl.pallas_call(
        _autoencoder_kernel,
        out_shape=jax.ShapeDtypeStruct((Bp, Q), x.dtype),
        grid_spec=pl.GridSpec(
            grid=grid,
            in_specs=[
                pl.BlockSpec((TB, Q), lambda i: (i, 0)),   # batch tile (pipelined)
                pl.BlockSpec((Q, Kp), lambda i: (0, 0)),   # resident encoder weight
                pl.BlockSpec((1, Kp), lambda i: (0, 0)),   # resident encoder bias
                pl.BlockSpec((Kp, Q), lambda i: (0, 0)),   # resident decoder weight
                pl.BlockSpec((1, Q), lambda i: (0, 0)),    # resident decoder bias
            ],
            out_specs=pl.BlockSpec((TB, Q), lambda i: (i, 0)),
        ),
        compiler_params=pltpu.CompilerParams(
            dimension_semantics=("parallel",)),
        cost_estimate=cost,
    )(x, wg, bg, wh, bh)

    return out[:B]


def reference_forward(x, wg, bg, wh, bh):
    h = jax.nn.sigmoid(x @ wg + bg.reshape(1, -1))
    return jax.nn.sigmoid(h @ wh + bh.reshape(1, -1))


if __name__ == "__main__":
    # Small shapes consistent with the module: user vector of num_question items.
    num_question = 256
    k = 100  # module default

    key = jax.random.PRNGKey(0)
    kx, kwg, kbg, kwh, kbh, kx2 = jax.random.split(key, 6)

    # Deterministic parameter init (mimicking nn.Linear's uniform(-1/sqrt(fan_in), ...)).
    bound_g = 1.0 / jnp.sqrt(num_question)
    bound_h = 1.0 / jnp.sqrt(k)
    # Stored as (in, out) — transpose of PyTorch's (out, in) weight layout.
    wg = jax.random.uniform(kwg, (num_question, k), jnp.float32, -bound_g, bound_g)
    bg = jax.random.uniform(kbg, (1, k), jnp.float32, -bound_g, bound_g)
    wh = jax.random.uniform(kwh, (k, num_question), jnp.float32, -bound_h, bound_h)
    bh = jax.random.uniform(kbh, (1, num_question), jnp.float32, -bound_h, bound_h)

    # --- Small batch (single grid step path).
    batch = 8
    x = jax.random.uniform(kx, (batch, num_question), jnp.float32)
    out = jax.block_until_ready(autoencoder_forward(x, wg, bg, wh, bh))
    ref = reference_forward(x, wg, bg, wh, bh)
    assert out.shape == (batch, num_question)
    assert jnp.allclose(out, ref, atol=1e-5, rtol=1e-5), "mismatch vs reference (B=8)"

    # --- Non-multiple batch (exercises batch tiling + padding path).
    batch2 = 300
    x2 = jax.random.uniform(kx2, (batch2, num_question), jnp.float32)
    out2 = jax.block_until_ready(autoencoder_forward(x2, wg, bg, wh, bh))
    ref2 = reference_forward(x2, wg, bg, wh, bh)
    assert out2.shape == (batch2, num_question)
    assert jnp.allclose(out2, ref2, atol=1e-5, rtol=1e-5), "mismatch vs reference (B=300)"

    print("KERNEL_OK")
</pallas_src>

<mosaic_0001>
module attributes {stable_mosaic.version = 11 : i64} {
  func.func @_autoencoder_kernel(%arg0: i32, %arg1: memref<8x256xf32, #tpu.memory_space<vmem>>, %arg2: memref<256x128xf32, #tpu.memory_space<vmem>>, %arg3: memref<1x128xf32, #tpu.memory_space<vmem>>, %arg4: memref<128x256xf32, #tpu.memory_space<vmem>>, %arg5: memref<1x256xf32, #tpu.memory_space<vmem>>, %arg6: memref<8x256xf32, #tpu.memory_space<vmem>>) attributes {dimension_semantics = [#tpu.dimension_semantics<parallel>], iteration_bounds = array<i64: 1>, scalar_prefetch = 0 : i64, scratch_operands = 0 : i64, tpu.core_type = #tpu.core_type<tc>, window_params = [{transform_indices = @transform_0, window_bounds = array<i64: 8, 256>}, {pipeline_mode = #tpu.pipeline_mode<synchronous>, transform_indices = @transform_1, window_bounds = array<i64: 256, 128>}, {pipeline_mode = #tpu.pipeline_mode<synchronous>, transform_indices = @transform_2, window_bounds = array<i64: 1, 128>}, {pipeline_mode = #tpu.pipeline_mode<synchronous>, transform_indices = @transform_3, window_bounds = array<i64: 128, 256>}, {pipeline_mode = #tpu.pipeline_mode<synchronous>, transform_indices = @transform_4, window_bounds = array<i64: 1, 256>}, {transform_indices = @transform_5, window_bounds = array<i64: 8, 256>}]} {
    %c0 = arith.constant 0 : index
    %c0_0 = arith.constant 0 : index
    %0 = vector.load %arg1[%c0, %c0_0] : memref<8x256xf32, #tpu.memory_space<vmem>>, vector<8x256xf32>
    %c0_1 = arith.constant 0 : index
    %c0_2 = arith.constant 0 : index
    %1 = vector.load %arg2[%c0_1, %c0_2] : memref<256x128xf32, #tpu.memory_space<vmem>>, vector<256x128xf32>
    %cst = arith.constant dense<0.000000e+00> : vector<8x128xf32>
    %2 = tpu.matmul %0, %1, %cst {dimension_numbers = #tpu.dot_dimension_numbers<[1], [0], [0], [1], [0, 0, 1, 1], [], []>} : vector<8x256xf32>, vector<256x128xf32>, vector<8x128xf32> -> vector<8x128xf32>
    %c0_3 = arith.constant 0 : index
    %c0_4 = arith.constant 0 : index
    %3 = vector.load %arg3[%c0_3, %c0_4] : memref<1x128xf32, #tpu.memory_space<vmem>>, vector<1x128xf32>
    %4 = vector.broadcast %3 : vector<1x128xf32> to vector<8x128xf32>
    %5 = arith.addf %2, %4 : vector<8x128xf32>
    %6 = arith.negf %5 : vector<8x128xf32>
    %7 = math.exp %6 : vector<8x128xf32>
    %cst_5 = arith.constant 1.000000e+00 : f32
    %8 = vector.broadcast %cst_5 : f32 to vector<8x128xf32>
    %9 = arith.addf %8, %7 : vector<8x128xf32>
    %10 = arith.divf %8, %9 : vector<8x128xf32>
    %c0_6 = arith.constant 0 : index
    %c0_7 = arith.constant 0 : index
    %11 = vector.load %arg4[%c0_6, %c0_7] : memref<128x256xf32, #tpu.memory_space<vmem>>, vector<128x256xf32>
    %cst_8 = arith.constant dense<0.000000e+00> : vector<8x256xf32>
    %12 = tpu.matmul %10, %11, %cst_8 {dimension_numbers = #tpu.dot_dimension_numbers<[1], [0], [0], [1], [0, 0, 1, 1], [], []>} : vector<8x128xf32>, vector<128x256xf32>, vector<8x256xf32> -> vector<8x256xf32>
    %c0_9 = arith.constant 0 : index
    %c0_10 = arith.constant 0 : index
    %13 = vector.load %arg5[%c0_9, %c0_10] : memref<1x256xf32, #tpu.memory_space<vmem>>, vector<1x256xf32>
    %14 = vector.broadcast %13 : vector<1x256xf32> to vector<8x256xf32>
    %15 = arith.addf %12, %14 : vector<8x256xf32>
    %16 = arith.negf %15 : vector<8x256xf32>
    %17 = math.exp %16 : vector<8x256xf32>
    %cst_11 = arith.constant 1.000000e+00 : f32
    %18 = vector.broadcast %cst_11 : f32 to vector<8x256xf32>
    %19 = arith.addf %18, %17 : vector<8x256xf32>
    %20 = arith.divf %18, %19 : vector<8x256xf32>
    %c0_12 = arith.constant 0 : index
    %c0_13 = arith.constant 0 : index
    %21 = vector.load %arg6[%c0_12, %c0_13] : memref<8x256xf32, #tpu.memory_space<vmem>>, vector<8x256xf32>
    tpu.vector_store %arg6[%c0_12, %c0_13], %20 {strides = array<i32>} : memref<8x256xf32, #tpu.memory_space<vmem>>, vector<8x256xf32>,
    return
  }
  func.func @transform_0(%arg0: i32) -> (i32, i32) {
    %c0_i32 = arith.constant 0 : i32
    %c0_i32_0 = arith.constant 0 : i32
    return %arg0, %c0_i32 : i32, i32
  }
  func.func @transform_1(%arg0: i32) -> (i32, i32) {
    %c0_i32 = arith.constant 0 : i32
    %c0_i32_0 = arith.constant 0 : i32
    %c0_i32_1 = arith.constant 0 : i32
    return %c0_i32, %c0_i32_0 : i32, i32
  }
  func.func @transform_2(%arg0: i32) -> (i32, i32) {
    %c0_i32 = arith.constant 0 : i32
    %c0_i32_0 = arith.constant 0 : i32
    %c0_i32_1 = arith.constant 0 : i32
    return %c0_i32, %c0_i32_0 : i32, i32
  }
  func.func @transform_3(%arg0: i32) -> (i32, i32) {
    %c0_i32 = arith.constant 0 : i32
    %c0_i32_0 = arith.constant 0 : i32
    %c0_i32_1 = arith.constant 0 : i32
    return %c0_i32, %c0_i32_0 : i32, i32
  }
  func.func @transform_4(%arg0: i32) -> (i32, i32) {
    %c0_i32 = arith.constant 0 : i32
    %c0_i32_0 = arith.constant 0 : i32
    %c0_i32_1 = arith.constant 0 : i32
    return %c0_i32, %c0_i32_0 : i32, i32
  }
  func.func @transform_5(%arg0: i32) -> (i32, i32) {
    %c0_i32 = arith.constant 0 : i32
    %c0_i32_0 = arith.constant 0 : i32
    return %arg0, %c0_i32 : i32, i32
  }
}

</mosaic_0001>

<bundles_post_ra>
// kernel: tpu_custom_call.1
= control target key start
LH: loop header
LB: loop body
LE: loop exit
PB: predicated region body
PF: predicated region fallthrough
CT: control target
= control target key end

     0   :  { %10 = vsyncpa [#allocation3], 0  ;;  %s525_s0 = inlined_call_operand.hbm [shape: f32[8,256], index: 0, kind: input, shape index: {}]   ;;  %s526_s1 = inlined_call_operand.hbm [shape: f32[256,128], index: 1, kind: input, shape index: {}]   ;;  %s527_s2 = inlined_call_operand.vmem [shape: f32[1,128], index: 2, kind: input, shape index: {}]   ;;  %s528_s3 = inlined_call_operand.hbm [shape: f32[128,256], index: 3, kind: input, shape index: {}]   ;;  %s529_s4 = inlined_call_operand.vmem [shape: f32[1,256], index: 4, kind: input, shape index: {}]   ;;  %s530_s5 = inlined_call_operand.hbm [shape: f32[8,256], index: 5, kind: output, shape index: {}]  }
   0x1   :  { %11 = vsyncpa [#allocation6], 0 }
   0x2   :  { %12 = vsyncpa [#allocation4], 0  ;;  %s468_s18 = smov [#allocation5]  }
   0x3   :  { %s28_s19 = sshll.u32 %s468_s18, 4  ;;  %s29_s19 = int_to_ptr.vmem [resolvable:$true] %s28_s19 }
   0x4   :  { %s390_s20 = scalar_lea.vmem %s29_s19, 4096  ;;  %p395_p1 = scmp.lt.s32.totalorder %s29_s19, %s29_s19 }
   0x5   :  { %p391_p0 = scmp.ne.s32.totalorder %s29_s19, %s390_s20  ;;  %p396_p2 = scmp.lt.s32.totalorder %s390_s20, %s390_s20 }
   0x7   :  { %p397_p3 = por %p396_p2, %p395_p1 }
   0x9   :  { %p398_p4 = pnand %p397_p3, %p391_p0 }
   0xb   :  { %401 = shalt.err (!%p398_p4)
}
   0xc   :  { %s469_s21 = smov 128   ;;  %s470_s22 = smov 8  }
   0xd   :  { %34 = dma.hbm_to_vmem [thread:$0]  %s526_s1, 4096, %s29_s19, [#allocation6], %s469_s21, %s469_s21, %s470_s22  }
   0xe   :  { %s471_s25 = smov [#allocation2]   ;;  %s472_s27 = smov [#allocation7]  }
   0xf   :  { %s19_s26 = sshll.u32 %s471_s25, 4  ;;  %s42_s28 = sshll.u32 %s472_s27, 4  ;;  %s20_s26 = int_to_ptr.vmem [resolvable:$true] %s19_s26  ;;  %s43_s28 = int_to_ptr.vmem [resolvable:$true] %s42_s28 }
  0x10   :  { %s410_s29 = scalar_lea.vmem %s20_s26, 256  ;;  %p415_p6 = scmp.lt.s32.totalorder %s20_s26, %s20_s26 }
  0x11   :  { %p411_p5 = scmp.ne.s32.totalorder %s20_s26, %s410_s29  ;;  %p416_p7 = scmp.lt.s32.totalorder %s410_s29, %s410_s29 }
  0x13   :  { %p417_p8 = por %p416_p7, %p415_p6 }
  0x15   :  { %p418_p9 = pnand %p417_p8, %p411_p5 }
  0x17   :  { %421 = shalt.err (!%p418_p9)
}
  0x18   :  { %22 = dma.hbm_to_vmem [thread:$0]  %s525_s0, 256, %s20_s26, [#allocation3]  }
  0x19   :  { %s430_s7 = scalar_lea.vmem %s43_s28, 4096  ;;  %p435_p11 = scmp.lt.s32.totalorder %s43_s28, %s43_s28 }
  0x1a   :  { %p431_p10 = scmp.ne.s32.totalorder %s43_s28, %s430_s7  ;;  %p436_p12 = scmp.lt.s32.totalorder %s430_s7, %s430_s7 }
  0x1c   :  { %p437_p13 = por %p436_p12, %p435_p11 }
  0x1e   :  { %p438_p0 = pnand %p437_p13, %p431_p10 }
  0x20   :  { %441 = shalt.err (!%p438_p0)
}
  0x21   :  { %s473_s1 = smov 256   ;;  %s474_s8 = smov 16  }
  0x22   :  { %48 = dma.hbm_to_vmem [thread:$0]  %s528_s3, 4096, %s43_s28, [#allocation6], %s473_s1, %s473_s1, %s474_s8  }
  0x23   :  { %462 = dma.done.wait [#allocation3], 256  }
  0x24   :  { %463 = vsyncadd [#allocation3], 4294967040 }
  0x25   :  { %464 = dma.done.wait [#allocation6], 8192  }
  0x26   :  { %465 = vsyncadd [#allocation6], 4294959104  ;;  %v93_v0 = vld [vmem:[#allocation5 + $0xf8] sm:$0xff]  ;;  %v92_v2 = vld [vmem:[#allocation5 + $0xf0] sm:$0xff]  ;;  %v475_v57 = vmov 0.0  }
  0x27   :  { %v77_v1 = vld [vmem:[#allocation5 + $0x78] sm:$0xff]  ;;  %326 = vmatprep.subr.mxu0 %v93_v0  ;;  %v76_v3 = vld [vmem:[#allocation5 + $0x70] sm:$0xff]  ;;  %v91_v4 = vld [vmem:[#allocation5 + $0xe8] sm:$0xff]  ;;  %285 = vmatprep.mubr.f32.mxu1 %v475_v57 }
  0x28   :  { %327 = vmatpush3.msra.mxu0 %v77_v1  ;;  %v75_v5 = vld [vmem:[#allocation5 + $0x68] sm:$0xff]  ;;  %v90_v6 = vld [vmem:[#allocation5 + $0xe0] sm:$0xff]  ;;  %v89_v8 = vld [vmem:[#allocation5 + $0xd8] sm:$0xff] }
  0x29   :  { %328 = vmatprep.subr.mxu0 %v92_v2  ;;  %v74_v7 = vld [vmem:[#allocation5 + $0x60] sm:$0xff]  ;;  %v73_v9 = vld [vmem:[#allocation5 + $0x58] sm:$0xff]  ;;  %v88_v10 = vld [vmem:[#allocation5 + $0xd0] sm:$0xff] }
  0x2a   :  { %329 = vmatpush3.msra.mxu0 %v76_v3  ;;  %v72_v11 = vld [vmem:[#allocation5 + $0x50] sm:$0xff]  ;;  %v87_v12 = vld [vmem:[#allocation5 + $0xc8] sm:$0xff]  ;;  %v61_v13 = vld [vmem:[#allocation2 + $0x8] sm:$0xff] }
  0x2b   :  { %330 = vmatprep.subr.mxu0 %v91_v4  ;;  %v71_v14 = vld [vmem:[#allocation5 + $0x48] sm:$0xff]  ;;  %165 = vmatprep.mubr.f32.mxu0 %v61_v13  ;;  %v86_v15 = vld [vmem:[#allocation5 + $0xc0] sm:$0xff]  ;;  %v85_v17 = vld [vmem:[#allocation5 + $0xb8] sm:$0xff] }
  0x2c   :  { %331 = vmatpush3.msra.mxu0 %v75_v5  ;;  %v70_v16 = vld [vmem:[#allocation5 + $0x40] sm:$0xff]  ;;  %v69_v18 = vld [vmem:[#allocation5 + $0x38] sm:$0xff]  ;;  %v84_v19 = vld [vmem:[#allocation5 + $0xb0] sm:$0xff] }
  0x2d   :  { %332 = vmatprep.subr.mxu0 %v90_v6  ;;  %v68_v20 = vld [vmem:[#allocation5 + $0x30] sm:$0xff]  ;;  %v83_v21 = vld [vmem:[#allocation5 + $0xa8] sm:$0xff]  ;;  %v82_v23 = vld [vmem:[#allocation5 + $0xa0] sm:$0xff] }
  0x2e   :  { %333 = vmatpush3.msra.mxu0 %v74_v7  ;;  %v67_v22 = vld [vmem:[#allocation5 + $0x28] sm:$0xff]  ;;  %v66_v24 = vld [vmem:[#allocation5 + $0x20] sm:$0xff]  ;;  %v81_v25 = vld [vmem:[#allocation5 + $0x98] sm:$0xff] }
  0x2f   :  { %334 = vmatprep.subr.mxu0 %v89_v8  ;;  %v65_v26 = vld [vmem:[#allocation5 + $0x18] sm:$0xff]  ;;  %v80_v27 = vld [vmem:[#allocation5 + $0x90] sm:$0xff]  ;;  %v79_v29 = vld [vmem:[#allocation5 + $0x88] sm:$0xff] }
  0x30   :  { %335 = vmatpush3.msra.mxu0 %v73_v9  ;;  %v64_v28 = vld [vmem:[#allocation5 + $0x10] sm:$0xff]  ;;  %v63_v30 = vld [vmem:[#allocation5 + $0x8] sm:$0xff]  ;;  %v78_v31 = vld [vmem:[#allocation5 + $0x80] sm:$0xff] }
  0x31   :  { %336 = vmatprep.subr.mxu0 %v88_v10  ;;  %v62_v32 = vld [vmem:[#allocation5] sm:$0xff]  ;;  %v60_v33 = vld [vmem:[#allocation2] sm:$0xff]  ;;  %v208_v34 = vld [vmem:[#allocation7 + $0xf8] sm:$0xff] }
  0x32   :  { %337 = vmatpush3.msra.mxu0 %v72_v11  ;;  %221 = vmatprep.subr.mxu1 %v208_v34  ;;  %v207_v35 = vld [vmem:[#allocation7 + $0xf0] sm:$0xff]  ;;  %v206_v36 = vld [vmem:[#allocation7 + $0xe8] sm:$0xff]  ;;  %v205_v37 = vld [vmem:[#allocation7 + $0xe0] sm:$0xff] }
  0x33   :  { %338 = vmatprep.subr.mxu0 %v87_v12  ;;  %222 = vmatpush1.msra.mxu1 %v207_v35  ;;  %v204_v38 = vld [vmem:[#allocation7 + $0xd8] sm:$0xff]  ;;  %v203_v39 = vld [vmem:[#allocation7 + $0xd0] sm:$0xff]  ;;  %v202_v40 = vld [vmem:[#allocation7 + $0xc8] sm:$0xff]  ;;  %v211_v12 = vlaneseq }
  0x34   :  { %339 = vmatpush3.msra.mxu0 %v71_v14  ;;  %223 = vmatprep.subr.mxu1 %v206_v36  ;;  %v201_v41 = vld [vmem:[#allocation7 + $0xc0] sm:$0xff]  ;;  %v200_v42 = vld [vmem:[#allocation7 + $0xb8] sm:$0xff]  ;;  %v199_v43 = vld [vmem:[#allocation7 + $0xb0] sm:$0xff] }
  0x35   :  { %340 = vmatprep.subr.mxu0 %v86_v15  ;;  %224 = vmatpush1.msra.mxu1 %v205_v37  ;;  %v198_v44 = vld [vmem:[#allocation7 + $0xa8] sm:$0xff]  ;;  %v197_v45 = vld [vmem:[#allocation7 + $0xa0] sm:$0xff]  ;;  %v196_v46 = vld [vmem:[#allocation7 + $0x98] sm:$0xff]  ;;  %v212_v13 = vshrl.u32 %v211_v12, 7 }
  0x36   :  { %341 = vmatpush3.msra.mxu0 %v70_v16  ;;  %225 = vmatprep.subr.mxu1 %v204_v38  ;;  %v195_v47 = vld [vmem:[#allocation7 + $0x90] sm:$0xff]  ;;  %v194_v48 = vld [vmem:[#allocation7 + $0x88] sm:$0xff]  ;;  %v193_v49 = vld [vmem:[#allocation7 + $0x80] sm:$0xff] }
  0x37   :  { %342 = vmatprep.subr.mxu0 %v85_v17  ;;  %226 = vmatpush1.msra.mxu1 %v203_v39  ;;  %v192_v50 = vld [vmem:[#allocation7 + $0x78] sm:$0xff]  ;;  %v191_v51 = vld [vmem:[#allocation7 + $0x70] sm:$0xff]  ;;  %v190_v52 = vld [vmem:[#allocation7 + $0x68] sm:$0xff]  ;;  %v213_v14 = vsub.s32 0, %v212_v13  ;;  %v217_v16 = vsub.s32 1, %v212_v13 }
  0x38   :  { %343 = vmatpush3.msra.mxu0 %v69_v18  ;;  %227 = vmatprep.subr.mxu1 %v202_v40  ;;  %v189_v53 = vld [vmem:[#allocation7 + $0x60] sm:$0xff]  ;;  %v188_v54 = vld [vmem:[#allocation7 + $0x58] sm:$0xff]  ;;  %v187_v55 = vld [vmem:[#allocation7 + $0x50] sm:$0xff] }
  0x39   :  { %344 = vmatprep.subr.mxu0 %v84_v19  ;;  %228 = vmatpush1.msra.mxu1 %v201_v41  ;;  %v186_v56 = vld [vmem:[#allocation7 + $0x48] sm:$0xff]  ;;  %v185_v58 = vld [vmem:[#allocation7 + $0x40] sm:$0xff]  ;;  %v184_v59 = vld [vmem:[#allocation7 + $0x38] sm:$0xff] }
  0x3a   :  { %345 = vmatpush3.msra.mxu0 %v68_v20  ;;  %229 = vmatprep.subr.mxu1 %v200_v42  ;;  %v183_v60 = vld [vmem:[#allocation7 + $0x30] sm:$0xff]  ;;  %v182_v61 = vld [vmem:[#allocation7 + $0x28] sm:$0xff]  ;;  %v181_v62 = vld [vmem:[#allocation7 + $0x20] sm:$0xff] }
  0x3b   :  { %346 = vmatprep.subr.mxu0 %v83_v21  ;;  %230 = vmatpush1.msra.mxu1 %v199_v43  ;;  %v180_v63 = vld [vmem:[#allocation7 + $0x18] sm:$0xff]  ;;  %v179_v0 = vld [vmem:[#allocation7 + $0x10] sm:$0xff]  ;;  %v178_v1 = vld [vmem:[#allocation7 + $0x8] sm:$0xff] }
  0x3c   :  { %347 = vmatpush3.msra.mxu0 %v67_v22  ;;  %231 = vmatprep.subr.mxu1 %v198_v44  ;;  %v177_v2 = vld [vmem:[#allocation7] sm:$0xff]  ;;  %v322_v4 = vld [vmem:[%s527_s2] ss:$0 sm:$0xff]  ;;  %s476_s2 = smov [#allocation8]  }
  0x3d   :  { %348 = vmatprep.subr.mxu0 %v82_v23  ;;  %232 = vmatpush1.msra.mxu1 %v197_v45  ;;  %v209_v15 = vld [vmem:[%s529_s4] sm:$0x3]  ;;  %s312_s13 = sshll.u32 %s476_s2, 4  ;;  %s313_s13 = int_to_ptr.vmem [resolvable:$true] %s312_s13 }
  0x3e   :  { %349 = vmatpush3.msra.mxu0 %v66_v24  ;;  %233 = vmatprep.subr.mxu1 %v196_v46  ;;  %v214_v17 = vrot.slane %v209_v15, %v213_v14  ;;  %v218_v18 = vrot.slane %v209_v15, %v217_v16  ;;  %s442_s4 = scalar_lea.vmem %s313_s13, 256  ;;  %p447_p2 = scmp.lt.s32.totalorder %s313_s13, %s313_s13 }
  0x3f   :  { %350 = vmatprep.subr.mxu0 %v81_v25  ;;  %234 = vmatpush1.msra.mxu1 %v195_v47  ;;  %p443_p1 = scmp.ne.s32.totalorder %s313_s13, %s442_s4  ;;  %p448_p3 = scmp.lt.s32.totalorder %s442_s4, %s442_s4 }
  0x40   :  { %351 = vmatpush3.msra.mxu0 %v65_v26  ;;  %235 = vmatprep.subr.mxu1 %v194_v48 }
  0x41   :  { %352 = vmatprep.subr.mxu0 %v80_v27  ;;  %236 = vmatpush1.msra.mxu1 %v193_v49  ;;  %p449_p4 = por %p448_p3, %p447_p2 }
  0x42   :  { %353 = vmatpush3.msra.mxu0 %v64_v28  ;;  %237 = vmatprep.subr.mxu1 %v192_v50 }
  0x43   :  { %354 = vmatprep.subr.mxu0 %v79_v29  ;;  %238 = vmatpush1.msra.mxu1 %v191_v51  ;;  %p450_p5 = pnand %p449_p4, %p443_p1 }
  0x44   :  { %355 = vmatpush3.msra.mxu0 %v63_v30  ;;  %239 = vmatprep.subr.mxu1 %v190_v52 }
  0x45   :  { %356 = vmatprep.subr.mxu0 %v78_v31  ;;  %240 = vmatpush1.msra.mxu1 %v189_v53 }
  0x46   :  { %357 = vmatpush3.msra.mxu0 %v62_v32  ;;  %241 = vmatprep.subr.mxu1 %v188_v54 }
  0x47   :  { %166 = vmatmul.mubr.f32.vlgmr.msra.gmra.mxu0 %v60_v33  ;;  %242 = vmatpush1.msra.mxu1 %v187_v55 }
  0x48   :  { %243 = vmatprep.subr.mxu1 %v186_v56 }
  0x49   :  { %244 = vmatpush1.msra.mxu1 %v185_v58 }
  0x4a   :  { %245 = vmatprep.subr.mxu1 %v184_v59 }
  0x4b   :  { %246 = vmatpush1.msra.mxu1 %v183_v60 }
  0x4c   :  { %247 = vmatprep.subr.mxu1 %v182_v61 }
  0x4d   :  { %248 = vmatpush1.msra.mxu1 %v181_v62 }
  0x4e   :  { %249 = vmatprep.subr.mxu1 %v180_v63 }
  0x4f   :  { %250 = vmatpush1.msra.mxu1 %v179_v0 }
  0x50   :  { %251 = vmatprep.subr.mxu1 %v178_v1 }
  0x51   :  { %252 = vmatpush1.msra.mxu1 %v177_v2 }
 0x107   :  { %v358_v3 = vpop.f32.mrf.mxu0 }
 0x109   :  { %v359_v5 = vpop.f32.mrf.mxu0 }
 0x10a   :  { %v360_v6 = vadd.f32 %v359_v5, %v358_v3 }
 0x10c   :  { %v168_v7 = vadd.f32 %v360_v6, %v322_v4 }
 0x10e   :  { %v323_v8 = vmul.f32 -1.442695, %v168_v7 }
 0x110   :  { %370 = vpow2.f32 %v323_v8 }
 0x11d   :  { %v371_v9 = vpop.eup %370 }
 0x11e   :  { %v174_v10 = vadd.f32 1.0, %v371_v9 }
 0x120   :  { %372 = vrcp.f32 %v174_v10 }
 0x12d   :  { %v373_v11 = vpop.eup %372 }
 0x12e   :  { %286 = vmatmul.mubr.f32.vlgmr.msra.gmra.mxu1 %v373_v11 }
 0x1ee   :  { %v287_v19 = vpop.f32.mrf.mxu1 }
 0x1ef   :  { %v288_v20 = vadd.f32 %v287_v19, %v214_v17 }
 0x1f0   :  { %v289_v21 = vpop.f32.mrf.mxu1 }
 0x1f1   :  { %v324_v22 = vmul.f32 -1.442695, %v288_v20  ;;  %v290_v23 = vadd.f32 %v289_v21, %v218_v18 }
 0x1f3   :  { %374 = vpow2.f32 %v324_v22  ;;  %v325_v24 = vmul.f32 -1.442695, %v290_v23 }
 0x1f5   :  { %376 = vpow2.f32 %v325_v24 }
 0x200   :  { %v375_v25 = vpop.eup %374 }
 0x201   :  { %v298_v26 = vadd.f32 1.0, %v375_v25 }
 0x202   :  { %v377_v27 = vpop.eup %376 }
 0x203   :  { %378 = vrcp.f32 %v298_v26  ;;  %v299_v28 = vadd.f32 1.0, %v377_v27 }
 0x205   :  { %380 = vrcp.f32 %v299_v28 }
 0x210   :  { %v379_v29 = vpop.eup %378 }
 0x211   :  { %304 = vst [vmem:[#allocation8] sm:$0xff] %v379_v29 }
 0x212   :  { %v381_v30 = vpop.eup %380 }
 0x213   :  { %305 = vst [vmem:[#allocation8 + $0x8] sm:$0xff] %v381_v30 }
 0x214   :  { %453 = shalt.err (!%p450_p5)
}
 0x215   :  { %315 = dma.vmem_to_hbm [thread:$0]  %s313_s13, 256, %s530_s5, [#allocation4]  }
 0x216   :  { %466 = dma.done.wait [#allocation4], 256  }
 0x217   :  { %467 = vsyncadd [#allocation4], 4294967040 }
 0x218   :  { %319 = vsyncpa [#allocation3], 1 }
 0x219   :  { %320 = vsyncpa [#allocation6], 1 }
 0x21a   :  { %321 = vsyncpa [#allocation4], 1 }

</bundles_post_ra>
